<compile_context>
chip_gen: v5e
topology: v5e:2x2
jax: 0.10.0
libtpu: 0.0.40
codegen_flags: <defaults>
</compile_context>

<pallas_src>
import functools

import jax
import jax.numpy as jnp
from jax.experimental import pallas as pl
from jax.experimental.pallas import tpu as pltpu


# --------------------------------------------------------------------------------
# Per-generation tuning knobs
# --------------------------------------------------------------------------------
@functools.lru_cache(maxsize=None)
def _tpu_vmem_capacity():
    try:
        return int(pltpu.get_tpu_info().vmem_capacity_bytes)
    except Exception:
        return 128 * 1024 * 1024  # v5e/v6e default


def _vmem_limit_bytes():
    # ~7/8 of physical VMEM: ~112 MiB on v5e/v6e (128 MiB), ~56 MiB on v7x (64 MiB).
    return min(_tpu_vmem_capacity() * 7 // 8, 112 * 1024 * 1024)


def _row_tile():
    # Pre-pass row tile: 512 rows on 128-MiB parts, 256 on v7x (64 MiB).
    return 512 if _tpu_vmem_capacity() > 64 * 1024 * 1024 else 256


def _largest_divisor_leq(n, target):
    for t in range(min(n, target), 0, -1):
        if n % t == 0:
            return t
    return 1


# --------------------------------------------------------------------------------
# Kernel A: time-parallel pre-pass.  LayerNorm and SiLU(res @ W_lin + b_lin) over the
# flattened [T*B, D] activations (one "parallel" grid axis, cdiv grid, masked remainder).
# --------------------------------------------------------------------------------
def _precompute_kernel(*refs, gating, layer_norm, matmul_dtype):
    it = iter(refs)
    x_ref = next(it)
    gamma_ref = next(it) if layer_norm else None
    beta_ref = next(it) if layer_norm else None
    wlin_ref = next(it) if gating else None
    blin_ref = next(it) if gating else None
    res_ref = next(it) if layer_norm else None
    silu_ref = next(it) if gating else None

    x = x_ref[...]  # [tm, D] f32
    if layer_norm:
        mean = jnp.mean(x, axis=-1, keepdims=True)
        var = jnp.mean((x - mean) ** 2, axis=-1, keepdims=True)
        res = (x - mean) * jax.lax.rsqrt(var + 1e-5) * gamma_ref[...] + beta_ref[...]
        res_ref[...] = res
    else:
        res = x

    if gating:
        lin = (jnp.dot(res.astype(matmul_dtype), wlin_ref[...],
                       preferred_element_type=jnp.float32) + blin_ref[...])
        silu_ref[...] = lin * jax.nn.sigmoid(lin)


def _precompute_pallas(x_tbd, p, *, gating, layer_norm, matmul_dtype):
    T, Bp, D = x_tbd.shape
    N = T * Bp
    x2 = x_tbd.reshape(N, D)  # time-major flatten (free)
    row_tile = _row_tile()
    tm = N if N <= row_tile else row_tile            # tm is full-extent or a multiple of 8
    grid = (pl.cdiv(N, tm),)                         # remainder rows are write-masked

    row_spec = pl.BlockSpec((tm, D), lambda i: (i, 0))
    vec_spec = pl.BlockSpec((1, D), lambda i: (0, 0))

    in_arrays, in_specs = [x2], [row_spec]
    if layer_norm:
        in_arrays += [p["gamma"], p["beta"]]
        in_specs += [vec_spec, vec_spec]
    if gating:
        in_arrays += [p["wlin"], p["blin"]]
        in_specs += [pl.BlockSpec((D, D), lambda i: (0, 0)), vec_spec]

    out_shapes, out_specs = [], []
    if layer_norm:
        out_shapes.append(jax.ShapeDtypeStruct((N, D), jnp.float32))
        out_specs.append(row_spec)
    if gating:
        out_shapes.append(jax.ShapeDtypeStruct((N, D), jnp.float32))
        out_specs.append(row_spec)

    kernel = functools.partial(_precompute_kernel, gating=gating,
                               layer_norm=layer_norm, matmul_dtype=matmul_dtype)
    outs = pl.pallas_call(
        kernel,
        out_shape=tuple(out_shapes),
        grid=grid,
        in_specs=in_specs,
        out_specs=tuple(out_specs),
        compiler_params=pltpu.CompilerParams(
            dimension_semantics=("parallel",),
            vmem_limit_bytes=_vmem_limit_bytes()),
    )(*in_arrays)

    outs = list(outs)
    res = outs.pop(0).reshape(T, Bp, D) if layer_norm else None
    silu = outs.pop(0).reshape(T, Bp, D) if gating else None
    return res, silu


# --------------------------------------------------------------------------------
# Kernel B: serial recurrence with the input projection fused in.
#   per time tile:  xg = res @ W_ih + b   (one big GEMM, kept in VMEM scratch)
#   per step:       gates = xg[t] + h @ W_hh ; LSTM cell update (i,f,o,g packed order)
#   post-pass:      out = out * silu + res   (single lane-dense VPU sweep)
# h/c state resident in VMEM scratch across the "arbitrary" time grid axis.
# --------------------------------------------------------------------------------
def _recurrent_kernel(*refs, gating, residual, matmul_dtype):
    it = iter(refs)
    res_ref = next(it)
    silu_ref = next(it) if gating else None
    wih_ref = next(it)
    whh_ref = next(it)
    b_ref = next(it)
    out_ref = next(it)
    h_out_ref = next(it)
    c_out_ref = next(it)
    h_sc = next(it)
    c_sc = next(it)
    xg_sc = next(it)

    ti = pl.program_id(0)
    tile_t, Bp, D = res_ref.shape

    @pl.when(ti == 0)
    def _():
        h_sc[...] = jnp.zeros_like(h_sc)
        c_sc[...] = jnp.zeros_like(c_sc)

    # Fused input projection for the whole time tile (Bp % 8 == 0 => reshape is a
    # layout no-op).  [tile_t*Bp, D] @ [D, 4D] — MXU-friendly M, no HBM round trip.
    x2 = res_ref[...].reshape(tile_t * Bp, D).astype(matmul_dtype)
    xg = jnp.dot(x2, wih_ref[...], preferred_element_type=jnp.float32) + b_ref[...]
    xg_sc[...] = xg.reshape(tile_t, Bp, 4 * D)

    whh = whh_ref[...]  # resident, matmul_dtype

    def step(tt, carry):
        h, c = carry
        gates = xg_sc[tt] + jnp.dot(h.astype(matmul_dtype), whh,
                                    preferred_element_type=jnp.float32)
        # Packed gate order (i, f, o, g): one sigmoid over 3D + one tanh over D.
        sig = jax.nn.sigmoid(gates[:, :3 * D])
        g_g = jnp.tanh(gates[:, 3 * D:])
        i_g = sig[:, :D]
        f_g = sig[:, D:2 * D]
        o_g = sig[:, 2 * D:]
        c_new = f_g * c + i_g * g_g
        h_new = o_g * jnp.tanh(c_new)
        out_ref[tt] = h_new
        return (h_new, c_new)

    unroll = True if tile_t <= 4 else 2   # keep vreg pressure low for large D
    h, c = jax.lax.fori_loop(0, tile_t, step, (h_sc[...], c_sc[...]), unroll=unroll)
    h_sc[...] = h
    c_sc[...] = c

    # Gating / residual hoisted out of the serial loop.
    if gating and residual:
        out_ref[...] = out_ref[...] * silu_ref[...] + res_ref[...]
    elif gating:
        out_ref[...] = out_ref[...] * silu_ref[...]
    elif residual:
        out_ref[...] = out_ref[...] + res_ref[...]

    # Final (h, c) written only on the last time block (resident output blocks).
    @pl.when(ti == pl.num_programs(0) - 1)
    def _():
        h_out_ref[...] = h
        c_out_ref[...] = c


def _recurrent_pallas(res, silu, wih, whh, b, *, gating, residual, matmul_dtype,
                      time_tile=32):
    T, Bp, D = res.shape
    tile_t = _largest_divisor_leq(T, time_tile)

    act_spec = pl.BlockSpec((tile_t, Bp, D), lambda ti: (ti, 0, 0))
    w_spec = pl.BlockSpec((D, 4 * D), lambda ti: (0, 0))
    state_spec = pl.BlockSpec((Bp, D), lambda ti: (0, 0))

    in_arrays, in_specs = [res], [act_spec]
    if gating:
        in_arrays.append(silu)
        in_specs.append(act_spec)
    in_arrays += [wih, whh, b]
    in_specs += [w_spec, w_spec, pl.BlockSpec((1, 4 * D), lambda ti: (0, 0))]

    kernel = functools.partial(_recurrent_kernel, gating=gating,
                               residual=residual, matmul_dtype=matmul_dtype)
    out, h, c = pl.pallas_call(
        kernel,
        out_shape=(
            jax.ShapeDtypeStruct((T, Bp, D), jnp.float32),
            jax.ShapeDtypeStruct((Bp, D), jnp.float32),
            jax.ShapeDtypeStruct((Bp, D), jnp.float32),
        ),
        grid=(T // tile_t,),
        in_specs=in_specs,
        out_specs=(act_spec, state_spec, state_spec),
        scratch_shapes=[
            pltpu.VMEM((Bp, D), jnp.float32),            # h state
            pltpu.VMEM((Bp, D), jnp.float32),            # c state
            pltpu.VMEM((tile_t, Bp, 4 * D), jnp.float32),  # fused gate pre-activations
        ],
        compiler_params=pltpu.CompilerParams(
            dimension_semantics=("arbitrary",),
            vmem_limit_bytes=_vmem_limit_bytes()),
    )(*in_arrays)
    return out, h, c


# --------------------------------------------------------------------------------
# Module wrappers
# --------------------------------------------------------------------------------
def _lstm_block(x_tbd, p, *, gating, residual, layer_norm):
    matmul_dtype = p["wih"].dtype
    if layer_norm or gating:
        res, silu = _precompute_pallas(x_tbd, p, gating=gating, layer_norm=layer_norm,
                                       matmul_dtype=matmul_dtype)
        if res is None:
            res = x_tbd
    else:
        res, silu = x_tbd, None
    out, h, c = _recurrent_pallas(res, silu, p["wih"], p["whh"], p["b"],
                                  gating=gating, residual=residual,
                                  matmul_dtype=matmul_dtype)
    return out, (h, c)


def lstm_sequence_model(x_btd, packed_layers, *, gating=True, residual=True,
                        layer_norm=True):
    """Forward pass of LSTMSequenceModel with state=None.

    x_btd: [B, T, D] (batch_first, like PyTorch).  Returns (y[B,T,D], states)."""
    B, T, D = x_btd.shape
    Bp = ((B + 7) // 8) * 8                     # sublane-align the batch once
    x = jnp.transpose(x_btd, (1, 0, 2))         # -> [T, B, D] time-major
    if Bp != B:
        x = jnp.pad(x, ((0, 0), (0, Bp - B), (0, 0)))
    states = []
    for p in packed_layers:
        x, (h, c) = _lstm_block(x, p, gating=gating, residual=residual,
                                layer_norm=layer_norm)
        states.append((h[:B], c[:B]))
    y = jnp.transpose(x[:, :B, :], (1, 0, 2))   # -> [B, T, D]
    return y, states


# ------------------------- parameters: init + pack -------------------------
def init_block_params(key, d_model):
    """PyTorch-style params (gate order i,f,g,o), used directly by the reference."""
    k = 1.0 / jnp.sqrt(d_model)
    ks = jax.random.split(key, 6)
    gamma = jnp.ones((1, d_model), jnp.float32)
    beta = jnp.zeros((1, d_model), jnp.float32)
    wih = jax.random.uniform(ks[0], (d_model, 4 * d_model), jnp.float32, -k, k)
    whh = jax.random.uniform(ks[1], (d_model, 4 * d_model), jnp.float32, -k, k)
    b_ih = jax.random.uniform(ks[2], (1, 4 * d_model), jnp.float32, -k, k)
    b_hh = jax.random.uniform(ks[3], (1, 4 * d_model), jnp.float32, -k, k)
    wlin = jax.random.uniform(ks[4], (d_model, d_model), jnp.float32, -k, k)
    blin = jax.random.uniform(ks[5], (1, d_model), jnp.float32, -k, k)
    return (gamma, beta, wih, whh, b_ih + b_hh, wlin, blin)


def _reorder_ifgo_to_ifog(w):
    d = w.shape[-1] // 4
    i, f, g, o = (w[..., k * d:(k + 1) * d] for k in range(4))
    return jnp.concatenate([i, f, o, g], axis=-1)


def pack_block_params(params, matmul_dtype=jnp.float32):
    """Reorder gates to (i,f,o,g) and pre-cast weights to matmul_dtype — once."""
    gamma, beta, wih, whh, b, wlin, blin = params
    return dict(
        gamma=gamma, beta=beta,
        wih=_reorder_ifgo_to_ifog(wih).astype(matmul_dtype),
        whh=_reorder_ifgo_to_ifog(whh).astype(matmul_dtype),
        b=_reorder_ifgo_to_ifog(b),                       # bias stays f32
        wlin=wlin.astype(matmul_dtype),
        blin=blin)


# ------------------------- pure-JAX reference for validation -------------------------
def ref_block(x, params):
    gamma, beta, wih, whh, b, wlin, blin = params
    B, T, D = x.shape
    mean = x.mean(-1, keepdims=True)
    var = ((x - mean) ** 2).mean(-1, keepdims=True)
    res = (x - mean) / jnp.sqrt(var + 1e-5) * gamma + beta

    def step(carry, r_t):
        h, c = carry
        gates = r_t @ wih + h @ whh + b
        i = jax.nn.sigmoid(gates[:, :D])
        f = jax.nn.sigmoid(gates[:, D:2 * D])
        g = jnp.tanh(gates[:, 2 * D:3 * D])
        o = jax.nn.sigmoid(gates[:, 3 * D:])
        c = f * c + i * g
        h = o * jnp.tanh(c)
        return (h, c), h

    init = (jnp.zeros((B, D), jnp.float32), jnp.zeros((B, D), jnp.float32))
    (h, c), outs = jax.lax.scan(step, init, jnp.transpose(res, (1, 0, 2)))
    out = jnp.transpose(outs, (1, 0, 2))
    lin = res @ wlin + blin
    out = out * (lin * jax.nn.sigmoid(lin))
    out = out + res
    return out, (h, c)


def ref_model(x, layer_params):
    states = []
    for p in layer_params:
        x, st = ref_block(x, p)
        states.append(st)
    return x, states


if __name__ == "__main__":
    B, T, D = 2, 8, 32
    N_LAYERS = 2

    key = jax.random.PRNGKey(0)
    kx, kp = jax.random.split(key)
    x = jax.random.normal(kx, (B, T, D), jnp.float32)
    layer_params = [init_block_params(k, D) for k in jax.random.split(kp, N_LAYERS)]

    # f32 path: strict validation against the pure-JAX reference.
    packed_f32 = [pack_block_params(p, jnp.float32) for p in layer_params]
    y, states = lstm_sequence_model(x, packed_f32)
    y = jax.block_until_ready(y)

    y_ref, states_ref = ref_model(x, layer_params)
    assert jnp.allclose(y, y_ref, atol=1e-4, rtol=1e-4), "output mismatch"
    for (h, c), (hr, cr) in zip(states, states_ref):
        assert jnp.allclose(h, hr, atol=1e-4, rtol=1e-4), "h state mismatch"
        assert jnp.allclose(c, cr, atol=1e-4, rtol=1e-4), "c state mismatch"

    # bf16 MXU path (higher throughput on v6e/v7x): loose-tolerance validation.
    packed_bf16 = [pack_block_params(p, jnp.bfloat16) for p in layer_params]
    y16, _ = lstm_sequence_model(x, packed_bf16)
    y16 = jax.block_until_ready(y16)
    err = float(jnp.max(jnp.abs(y16 - y_ref)))
    assert jnp.isfinite(err) and err < 0.15, f"bf16 path deviates too much: {err}"

    print("KERNEL_OK")
</pallas_src>

<mosaic_0001>
module attributes {stable_mosaic.version = 11 : i64} {
  func.func @_precompute_kernel(%arg0: i32, %arg1: memref<64x32xf32, #tpu.memory_space<vmem>>, %arg2: memref<1x32xf32, #tpu.memory_space<vmem>>, %arg3: memref<1x32xf32, #tpu.memory_space<vmem>>, %arg4: memref<32x32xf32, #tpu.memory_space<vmem>>, %arg5: memref<1x32xf32, #tpu.memory_space<vmem>>, %arg6: memref<64x32xf32, #tpu.memory_space<vmem>>, %arg7: memref<64x32xf32, #tpu.memory_space<vmem>>) attributes {dimension_semantics = [#tpu.dimension_semantics<parallel>], iteration_bounds = array<i64: 1>, scalar_prefetch = 0 : i64, scratch_operands = 0 : i64, tpu.core_type = #tpu.core_type<tc>, window_params = [{transform_indices = @transform_0, window_bounds = array<i64: 64, 32>}, {pipeline_mode = #tpu.pipeline_mode<synchronous>, transform_indices = @transform_1, window_bounds = array<i64: 1, 32>}, {pipeline_mode = #tpu.pipeline_mode<synchronous>, transform_indices = @transform_2, window_bounds = array<i64: 1, 32>}, {pipeline_mode = #tpu.pipeline_mode<synchronous>, transform_indices = @transform_3, window_bounds = array<i64: 32, 32>}, {pipeline_mode = #tpu.pipeline_mode<synchronous>, transform_indices = @transform_4, window_bounds = array<i64: 1, 32>}, {transform_indices = @transform_5, window_bounds = array<i64: 64, 32>}, {transform_indices = @transform_6, window_bounds = array<i64: 64, 32>}]} {
    %c0 = arith.constant 0 : index
    %c0_0 = arith.constant 0 : index
    %0 = vector.load %arg1[%c0, %c0_0] : memref<64x32xf32, #tpu.memory_space<vmem>>, vector<64x32xf32>
    %cst = arith.constant dense<0.000000e+00> : vector<64xf32>
    %1 = vector.multi_reduction <add>, %0, %cst [1] : vector<64x32xf32> to vector<64xf32>
    %2 = vector.shape_cast %1 : vector<64xf32> to vector<64x1xf32>
    %cst_1 = arith.constant 3.200000e+01 : f32
    %3 = vector.broadcast %cst_1 : f32 to vector<64x1xf32>
    %4 = arith.divf %2, %3 : vector<64x1xf32>
    %5 = vector.broadcast %4 : vector<64x1xf32> to vector<64x32xf32>
    %6 = arith.subf %0, %5 : vector<64x32xf32>
    %7 = arith.mulf %6, %6 : vector<64x32xf32>
    %cst_2 = arith.constant dense<0.000000e+00> : vector<64xf32>
    %8 = vector.multi_reduction <add>, %7, %cst_2 [1] : vector<64x32xf32> to vector<64xf32>
    %9 = vector.shape_cast %8 : vector<64xf32> to vector<64x1xf32>
    %cst_3 = arith.constant 3.200000e+01 : f32
    %10 = vector.broadcast %cst_3 : f32 to vector<64x1xf32>
    %11 = arith.divf %9, %10 : vector<64x1xf32>
    %12 = vector.broadcast %4 : vector<64x1xf32> to vector<64x32xf32>
    %13 = arith.subf %0, %12 : vector<64x32xf32>
    %cst_4 = arith.constant 9.99999974E-6 : f32
    %14 = vector.broadcast %cst_4 : f32 to vector<64x1xf32>
    %15 = arith.addf %11, %14 : vector<64x1xf32>
    %16 = math.rsqrt %15 : vector<64x1xf32>
    %17 = vector.broadcast %16 : vector<64x1xf32> to vector<64x32xf32>
    %18 = arith.mulf %13, %17 : vector<64x32xf32>
    %c0_5 = arith.constant 0 : index
    %c0_6 = arith.constant 0 : index
    %19 = vector.load %arg2[%c0_5, %c0_6] : memref<1x32xf32, #tpu.memory_space<vmem>>, vector<1x32xf32>
    %20 = vector.broadcast %19 : vector<1x32xf32> to vector<64x32xf32>
    %21 = arith.mulf %18, %20 : vector<64x32xf32>
    %c0_7 = arith.constant 0 : index
    %c0_8 = arith.constant 0 : index
    %22 = vector.load %arg3[%c0_7, %c0_8] : memref<1x32xf32, #tpu.memory_space<vmem>>, vector<1x32xf32>
    %23 = vector.broadcast %22 : vector<1x32xf32> to vector<64x32xf32>
    %24 = arith.addf %21, %23 : vector<64x32xf32>
    %c0_9 = arith.constant 0 : index
    %c0_10 = arith.constant 0 : index
    %25 = vector.load %arg6[%c0_9, %c0_10] : memref<64x32xf32, #tpu.memory_space<vmem>>, vector<64x32xf32>
    tpu.vector_store %arg6[%c0_9, %c0_10], %24 {strides = array<i32>} : memref<64x32xf32, #tpu.memory_space<vmem>>, vector<64x32xf32>,
    %c0_11 = arith.constant 0 : index
    %c0_12 = arith.constant 0 : index
    %26 = vector.load %arg4[%c0_11, %c0_12] : memref<32x32xf32, #tpu.memory_space<vmem>>, vector<32x32xf32>
    %cst_13 = arith.constant dense<0.000000e+00> : vector<64x32xf32>
    %27 = tpu.matmul %24, %26, %cst_13 {dimension_numbers = #tpu.dot_dimension_numbers<[1], [0], [0], [1], [0, 0, 1, 1], [], []>} : vector<64x32xf32>, vector<32x32xf32>, vector<64x32xf32> -> vector<64x32xf32>
    %c0_14 = arith.constant 0 : index
    %c0_15 = arith.constant 0 : index
    %28 = vector.load %arg5[%c0_14, %c0_15] : memref<1x32xf32, #tpu.memory_space<vmem>>, vector<1x32xf32>
    %29 = vector.broadcast %28 : vector<1x32xf32> to vector<64x32xf32>
    %30 = arith.addf %27, %29 : vector<64x32xf32>
    %31 = arith.negf %30 : vector<64x32xf32>
    %32 = math.exp %31 : vector<64x32xf32>
    %cst_16 = arith.constant 1.000000e+00 : f32
    %33 = vector.broadcast %cst_16 : f32 to vector<64x32xf32>
    %34 = arith.addf %33, %32 : vector<64x32xf32>
    %35 = arith.divf %33, %34 : vector<64x32xf32>
    %36 = arith.mulf %30, %35 : vector<64x32xf32>
    %c0_17 = arith.constant 0 : index
    %c0_18 = arith.constant 0 : index
    %37 = vector.load %arg7[%c0_17, %c0_18] : memref<64x32xf32, #tpu.memory_space<vmem>>, vector<64x32xf32>
    tpu.vector_store %arg7[%c0_17, %c0_18], %36 {strides = array<i32>} : memref<64x32xf32, #tpu.memory_space<vmem>>, vector<64x32xf32>,
    return
  }
  func.func @transform_0(%arg0: i32) -> (i32, i32) {
    %c0_i32 = arith.constant 0 : i32
    %c0_i32_0 = arith.constant 0 : i32
    return %arg0, %c0_i32 : i32, i32
  }
  func.func @transform_1(%arg0: i32) -> (i32, i32) {
    %c0_i32 = arith.constant 0 : i32
    %c0_i32_0 = arith.constant 0 : i32
    %c0_i32_1 = arith.constant 0 : i32
    return %c0_i32, %c0_i32_0 : i32, i32
  }
  func.func @transform_2(%arg0: i32) -> (i32, i32) {
    %c0_i32 = arith.constant 0 : i32
    %c0_i32_0 = arith.constant 0 : i32
    %c0_i32_1 = arith.constant 0 : i32
    return %c0_i32, %c0_i32_0 : i32, i32
  }
  func.func @transform_3(%arg0: i32) -> (i32, i32) {
    %c0_i32 = arith.constant 0 : i32
    %c0_i32_0 = arith.constant 0 : i32
    %c0_i32_1 = arith.constant 0 : i32
    return %c0_i32, %c0_i32_0 : i32, i32
  }
  func.func @transform_4(%arg0: i32) -> (i32, i32) {
    %c0_i32 = arith.constant 0 : i32
    %c0_i32_0 = arith.constant 0 : i32
    %c0_i32_1 = arith.constant 0 : i32
    return %c0_i32, %c0_i32_0 : i32, i32
  }
  func.func @transform_5(%arg0: i32) -> (i32, i32) {
    %c0_i32 = arith.constant 0 : i32
    %c0_i32_0 = arith.constant 0 : i32
    return %arg0, %c0_i32 : i32, i32
  }
  func.func @transform_6(%arg0: i32) -> (i32, i32) {
    %c0_i32 = arith.constant 0 : i32
    %c0_i32_0 = arith.constant 0 : i32
    return %arg0, %c0_i32 : i32, i32
  }
}

</mosaic_0001>

<bundles_post_ra>
// kernel: tpu_custom_call.1
= control target key start
LH: loop header
LB: loop body
LE: loop exit
PB: predicated region body
PF: predicated region fallthrough
CT: control target
= control target key end

     0   :  { %vm30_vm0 = vcmask 261120   ;;  %v577_v16 = vmov 32.0   ;;  %s974_s0 = inlined_call_operand.vmem [shape: f32[64,32], index: 0, kind: input, shape index: {}]   ;;  %s975_s1 = inlined_call_operand.vmem [shape: f32[1,32], index: 1, kind: input, shape index: {}]   ;;  %s976_s2 = inlined_call_operand.vmem [shape: f32[1,32], index: 2, kind: input, shape index: {}]   ;;  %s977_s4 = inlined_call_operand.vmem [shape: f32[1,32], index: 4, kind: input, shape index: {}]   ;;  %s978_s3 = inlined_call_operand.vmem [shape: f32[32,32], index: 3, kind: input, shape index: {}]   ;;  %s979_s5 = inlined_call_operand.vmem [shape: f32[64,32], index: 5, kind: output, shape index: {0}]   ;;  %s980_s6 = inlined_call_operand.vmem [shape: f32[64,32], index: 6, kind: output, shape index: {1}]  }
   0x1   :  { %v27_v0 = vld [vmem:[%s974_s0 + $0x28] sm:$0xff]  ;;  %v26_v1 = vld [vmem:[%s974_s0 + $0x20] sm:$0xff]  ;;  %v29_v6 = vld [vmem:[%s974_s0 + $0x38] sm:$0xff]  ;;  %527 = vrcp.f32 %v577_v16 }
   0x2   :  { %v22_v2 = vld [vmem:[%s974_s0] sm:$0xff]  ;;  %v46_v3 = vsel %vm30_vm0, %v27_v0, 0.0  ;;  %v43_v4 = vsel %vm30_vm0, %v26_v1, 0.0  ;;  %v28_v7 = vld [vmem:[%s974_s0 + $0x30] sm:$0xff]  ;;  %v52_v9 = vsel %vm30_vm0, %v29_v6, 0.0  ;;  %v23_v12 = vld [vmem:[%s974_s0 + $0x8] sm:$0xff] }
   0x3   :  { %v31_v5 = vsel %vm30_vm0, %v22_v2, 0.0  ;;  %47 = vadd.xlane.f32.xlu2 %v46_v3  ;;  %44 = vadd.xlane.f32.xlu0 %v43_v4  ;;  %v24_v8 = vld [vmem:[%s974_s0 + $0x10] sm:$0xff]  ;;  %v49_v10 = vsel %vm30_vm0, %v28_v7, 0.0  ;;  %v25_v13 = vld [vmem:[%s974_s0 + $0x18] sm:$0xff]  ;;  %v34_v14 = vsel %vm30_vm0, %v23_v12, 0.0 }
   0x4   :  { %32 = vadd.xlane.f32.xlu1 %v31_v5  ;;  %v37_v11 = vsel %vm30_vm0, %v24_v8, 0.0  ;;  %v40_v15 = vsel %vm30_vm0, %v25_v13, 0.0  ;;  %v249_v63 = vld [vmem:[%s978_s3 + $0x18] sm:$0xff] }
   0x5   :  { %290 = vmatpush.msra.mxu0 %v249_v63  ;;  %512 = vmatpush.msra.mxu2 %v249_v63 }
   0x6   :  { %511 = vmatpush.msra.mxu1 %v249_v63  ;;  %513 = vmatpush.msra.mxu3 %v249_v63  ;;  %v759_v63 = vld [vmem:[%s976_s2] ss:$0 sm:$0xff] }
   0x7   :  { %v528_v17 = vpop.eup %527 }
   0x8   :  { %v56_v18 = vmul.f32 32.0, %v528_v17  ;;  %vm60_vm1 = vweird.f32 %v528_v17 }
   0xa   :  { %v57_v19 = vsub.f32 1.0, %v56_v18 }
   0xb   :  { %53 = vadd.xlane.f32.xlu2 %v52_v9  ;;  %50 = vadd.xlane.f32.xlu0 %v49_v10 }
   0xc   :  { %38 = vadd.xlane.f32.xlu1 %v37_v11  ;;  %v58_v20 = vmul.f32 %v528_v17, %v57_v19 }
   0xe   :  { %v59_v21 = vadd.f32 %v528_v17, %v58_v20 }
  0x10   :  { %v645_v22 = vsel %vm60_vm1, %v528_v17, %v59_v21 }
  0x13   :  { %35 = vadd.xlane.f32.xlu0 %v34_v14 }
  0x14   :  { %41 = vadd.xlane.f32.xlu1 %v40_v15 }
  0x76   :  { %v48_v23 = vpop.xlane.xlu2 %47  ;;  %v45_v24 = vpop.xlane.xlu0 %44 }
  0x77   :  { %v66_v25 = vmul.f32 %v645_v22, %v45_v24  ;;  %v33_v26 = vpop.xlane.xlu1 %32  ;;  %v67_v40 = vmul.f32 %v645_v22, %v48_v23 }
  0x78   :  { %v62_v27 = vmul.f32 %v645_v22, %v33_v26 }
  0x79   :  { %v649_v28 = vsub.f32 %v26_v1, %v66_v25  ;;  %v675_v47 = vsub.f32 %v27_v0, %v67_v40  ;;  %v248_v0 = vld [vmem:[%s978_s3 + $0x10] sm:$0xff]  ;;  %v247_v1 = vld [vmem:[%s978_s3 + $0x8] sm:$0xff] }
  0x7a   :  { %v651_v29 = vsub.f32 %v22_v2, %v62_v27  ;;  %291 = vmatpush.msra.mxu0 %v248_v0  ;;  %515 = vmatpush.msra.mxu2 %v248_v0  ;;  %v246_v2 = vld [vmem:[%s978_s3] sm:$0xff] }
  0x7b   :  { %v82_v30 = vmul.f32 %v649_v28, %v649_v28  ;;  %v83_v56 = vmul.f32 %v675_v47, %v675_v47  ;;  %514 = vmatpush.msra.mxu1 %v248_v0  ;;  %516 = vmatpush.msra.mxu3 %v248_v0 }
  0x7c   :  { %v78_v31 = vmul.f32 %v651_v29, %v651_v29  ;;  %292 = vmatpush.msra.mxu0 %v247_v1  ;;  %518 = vmatpush.msra.mxu2 %v247_v1 }
  0x7d   :  { %v98_v32 = vsel %vm30_vm0, %v82_v30, 0.0  ;;  %v101_v59 = vsel %vm30_vm0, %v83_v56, 0.0  ;;  %517 = vmatpush.msra.mxu1 %v247_v1  ;;  %519 = vmatpush.msra.mxu3 %v247_v1 }
  0x7e   :  { %v54_v33 = vpop.xlane.xlu2 %53  ;;  %99 = vadd.xlane.f32.xlu2 %v98_v32  ;;  %v51_v34 = vpop.xlane.xlu0 %50  ;;  %v86_v35 = vsel %vm30_vm0, %v78_v31, 0.0  ;;  %293 = vmatpush.msra.mxu0 %v246_v2 }
  0x7f   :  { %v69_v36 = vmul.f32 %v645_v22, %v54_v33  ;;  %v68_v37 = vmul.f32 %v645_v22, %v51_v34  ;;  %87 = vadd.xlane.f32.xlu1 %v86_v35  ;;  %v39_v38 = vpop.xlane.xlu1 %38  ;;  %521 = vmatpush.msra.mxu2 %v246_v2 }
  0x80   :  { %v64_v39 = vmul.f32 %v645_v22, %v39_v38  ;;  %520 = vmatpush.msra.mxu1 %v246_v2  ;;  %522 = vmatpush.msra.mxu3 %v246_v2 }
  0x81   :  { %v663_v41 = vsub.f32 %v29_v6, %v69_v36  ;;  %v665_v42 = vsub.f32 %v28_v7, %v68_v37 }
  0x82   :  { %v667_v43 = vsub.f32 %v24_v8, %v64_v39 }
  0x83   :  { %v84_v44 = vmul.f32 %v665_v42, %v665_v42  ;;  %v85_v45 = vmul.f32 %v663_v41, %v663_v41 }
  0x84   :  { %v80_v46 = vmul.f32 %v667_v43, %v667_v43 }
  0x85   :  { %v104_v48 = vsel %vm30_vm0, %v84_v44, 0.0  ;;  %v107_v49 = vsel %vm30_vm0, %v85_v45, 0.0 }
  0x86   :  { %105 = vadd.xlane.f32.xlu0 %v104_v48  ;;  %v36_v50 = vpop.xlane.xlu0 %35  ;;  %v92_v51 = vsel %vm30_vm0, %v80_v46, 0.0 }
  0x87   :  { %v63_v52 = vmul.f32 %v645_v22, %v36_v50  ;;  %108 = vadd.xlane.f32.xlu1 %v107_v49  ;;  %93 = vadd.xlane.f32.xlu2 %v92_v51  ;;  %v42_v53 = vpop.xlane.xlu1 %41 }
  0x88   :  { %v65_v54 = vmul.f32 %v645_v22, %v42_v53 }
  0x89   :  { %v682_v55 = vsub.f32 %v23_v12, %v63_v52  ;;  %v747_v52 = vld [vmem:[%s975_s1] ss:$0 sm:$0xff] }
  0x8a   :  { %v688_v58 = vsub.f32 %v25_v13, %v65_v54 }
  0x8b   :  { %v79_v57 = vmul.f32 %v682_v55, %v682_v55 }
  0x8c   :  { %v81_v61 = vmul.f32 %v688_v58, %v688_v58 }
  0x8d   :  { %v89_v60 = vsel %vm30_vm0, %v79_v57, 0.0 }
  0x8e   :  { %102 = vadd.xlane.f32.xlu0 %v101_v59  ;;  %v95_v62 = vsel %vm30_vm0, %v81_v61, 0.0 }
  0x8f   :  { %90 = vadd.xlane.f32.xlu2 %v89_v60 }
  0x96   :  { %96 = vadd.xlane.f32.xlu0 %v95_v62 }
  0xf1   :  { %v100_v3 = vpop.xlane.xlu2 %99 }
  0xf2   :  { %v114_v4 = vmul.f32 %v100_v3, %v645_v22  ;;  %v88_v5 = vpop.xlane.xlu1 %87 }
  0xf3   :  { %v110_v6 = vmul.f32 %v88_v5, %v645_v22 }
  0xf4   :  { %v122_v7 = vadd.f32 1e-05, %v114_v4 }
  0xf5   :  { %v118_v8 = vadd.f32 1e-05, %v110_v6 }
  0xf6   :  { %529 = vrsqrt.f32 %v122_v7  ;;  %vm172_vm5 = vweird.f32 %v122_v7 }
  0xf7   :  { %531 = vrsqrt.f32 %v118_v8  ;;  %vm132_vm3 = vweird.f32 %v118_v8 }
  0xf9   :  { %v106_v9 = vpop.xlane.xlu0 %105 }
  0xfa   :  { %v116_v10 = vmul.f32 %v106_v9, %v645_v22  ;;  %v94_v11 = vpop.xlane.xlu2 %93  ;;  %v109_v12 = vpop.xlane.xlu1 %108 }
  0xfb   :  { %v112_v13 = vmul.f32 %v94_v11, %v645_v22  ;;  %v117_v14 = vmul.f32 %v109_v12, %v645_v22 }
  0xfc   :  { %v530_v15 = vpop.eup %529  ;;  %v712_v16 = vadd.f32 1e-05, %v116_v10 }
  0xfd   :  { %v532_v17 = vpop.eup %531  ;;  %v167_v18 = vmul.f32 %v530_v15, %v122_v7  ;;  %v714_v19 = vadd.f32 1e-05, %v112_v13  ;;  %v716_v20 = vadd.f32 1e-05, %v117_v14  ;;  %vm173_vm2 = vweird.f32 %v530_v15 }
  0xfe   :  { %v127_v21 = vmul.f32 %v532_v17, %v118_v8  ;;  %533 = vrsqrt.f32 %v712_v16  ;;  %vm133_vm4 = vweird.f32 %v532_v17  ;;  %vm733_vm6 = vmor %vm172_vm5, %vm173_vm2  ;;  %vm192_vm8 = vweird.f32 %v712_v16 }
  0xff   :  { %v168_v23 = vmul.f32 %v530_v15, %v167_v18  ;;  %535 = vrsqrt.f32 %v714_v19  ;;  %vm134_vm7 = vmor %vm132_vm3, %vm133_vm4  ;;  %vm152_vm9 = vweird.f32 %v714_v19  ;;  %vm202_vm10 = vweird.f32 %v716_v20 }
 0x100   :  { %v128_v24 = vmul.f32 %v532_v17, %v127_v21  ;;  %537 = vrsqrt.f32 %v716_v20 }
 0x101   :  { %v169_v25 = vmul.f32 0.5, %v168_v23  ;;  %v103_v26 = vpop.xlane.xlu0 %102 }
 0x102   :  { %v129_v27 = vmul.f32 0.5, %v128_v24  ;;  %v115_v30 = vmul.f32 %v103_v26, %v645_v22  ;;  %v91_v31 = vpop.xlane.xlu2 %90 }
 0x103   :  { %v170_v32 = vsub.f32 1.5, %v169_v25  ;;  %v111_v33 = vmul.f32 %v91_v31, %v645_v22 }
 0x104   :  { %v723_v34 = vpop.eup %533  ;;  %v130_v35 = vsub.f32 1.5, %v129_v27  ;;  %v725_v36 = vadd.f32 1e-05, %v115_v30 }
 0x105   :  { %v727_v37 = vpop.eup %535  ;;  %v171_v38 = vmul.f32 %v530_v15, %v170_v32  ;;  %v187_v39 = vmul.f32 %v723_v34, %v712_v16  ;;  %v731_v40 = vadd.f32 1e-05, %v111_v33  ;;  %vm193_vm11 = vweird.f32 %v723_v34 }
 0x106   :  { %v538_v44 = vpop.eup %537  ;;  %v131_v46 = vmul.f32 %v532_v17, %v130_v35  ;;  %v147_v48 = vmul.f32 %v727_v37, %v714_v19  ;;  %539 = vrsqrt.f32 %v725_v36  ;;  %vm153_vm12 = vweird.f32 %v727_v37  ;;  %vm194_vm14 = vmor %vm192_vm8, %vm193_vm11 }
 0x107   :  { %v175_v49 = vsel %vm733_vm6, %v530_v15, %v171_v38  ;;  %v188_v50 = vmul.f32 %v723_v34, %v187_v39  ;;  %v197_v51 = vmul.f32 %v538_v44, %v716_v20  ;;  %541 = vrsqrt.f32 %v731_v40  ;;  %vm154_vm15 = vmor %vm152_vm9, %vm153_vm12 }
 0x108   :  { %v135_v53 = vsel %vm134_vm7, %v532_v17, %v131_v46  ;;  %v148_v54 = vmul.f32 %v727_v37, %v147_v48  ;;  %v210_v0 = vmul.f32 %v175_v49, %v649_v28  ;;  %vm203_vm13 = vweird.f32 %v538_v44 }
 0x109   :  { %v189_v56 = vmul.f32 0.5, %v188_v50  ;;  %v198_v57 = vmul.f32 %v538_v44, %v197_v51  ;;  %v97_v59 = vpop.xlane.xlu0 %96  ;;  %v206_v60 = vmul.f32 %v135_v53, %v651_v29  ;;  %vm204_vm1 = vmor %vm202_vm10, %vm203_vm13  ;;  %vm182_vm3 = vweird.f32 %v725_v36 }
 0x10a   :  { %v149_v61 = vmul.f32 0.5, %v148_v54  ;;  %v113_v62 = vmul.f32 %v97_v59, %v645_v22  ;;  %v222_v22 = vmul.f32 %v747_v52, %v210_v0  ;;  %vm142_vm4 = vweird.f32 %v731_v40 }
 0x10b   :  { %v190_v1 = vsub.f32 1.5, %v189_v56  ;;  %v199_v2 = vmul.f32 0.5, %v198_v57  ;;  %v218_v3 = vmul.f32 %v747_v52, %v206_v60  ;;  %v526_v56 = vld [vmem:[%s977_s4] ss:$0 sm:$0xff] }
 0x10c   :  { %v540_v4 = vpop.eup %539  ;;  %v150_v29 = vsub.f32 1.5, %v149_v61  ;;  %v765_v5 = vadd.f32 1e-05, %v113_v62  ;;  %v234_v16 = vadd.f32 %v759_v63, %v222_v22 }
 0x10d   :  { %v191_v6 = vmul.f32 %v723_v34, %v190_v1  ;;  %v200_v7 = vsub.f32 1.5, %v199_v2  ;;  %v177_v28 = vmul.f32 %v540_v4, %v725_v36  ;;  %v542_v8 = vpop.eup %541  ;;  %v230_v10 = vadd.f32 %v759_v63, %v218_v3 }
 0x10e   :  { %v151_v9 = vmul.f32 %v727_v37, %v150_v29  ;;  %543 = vrsqrt.f32 %v765_v5  ;;  %v137_v14 = vmul.f32 %v542_v8, %v731_v40  ;;  %242 = vst.msk [vmem:[%s979_s5 + $0x20] sm:$0xff] %vm30_vm0, %v234_v16  ;;  %499 = vmatmul.msk.f32.vlgmr.msra.gmra.mxu2 %vm30_vm0, %v234_v16  ;;  %vm183_vm2 = vweird.f32 %v540_v4 }
 0x10f   :  { %v195_v11 = vsel %vm194_vm14, %v723_v34, %v191_v6  ;;  %v201_v12 = vmul.f32 %v538_v44, %v200_v7  ;;  %v178_v13 = vmul.f32 %v540_v4, %v177_v28  ;;  %238 = vst.msk [vmem:[%s979_s5] sm:$0xff] %vm30_vm0, %v230_v10  ;;  %495 = vmatmul.msk.f32.vlgmr.msra.gmra.mxu0 %vm30_vm0, %v230_v10  ;;  %vm143_vm5 = vweird.f32 %v542_v8  ;;  %vm184_vm6 = vmor %vm182_vm3, %vm183_vm2 }
 0x110   :  { %v155_v15 = vsel %vm154_vm15, %v727_v37, %v151_v9  ;;  %v212_v17 = vmul.f32 %v195_v11, %v665_v42  ;;  %v138_v21 = vmul.f32 %v542_v8, %v137_v14  ;;  %vm144_vm7 = vmor %vm142_vm4, %vm143_vm5  ;;  %vm162_vm9 = vweird.f32 %v765_v5 }
 0x111   :  { %v205_v18 = vsel %vm204_vm1, %v538_v44, %v201_v12  ;;  %v179_v19 = vmul.f32 0.5, %v178_v13  ;;  %v208_v23 = vmul.f32 %v155_v15, %v667_v43 }
 0x112   :  { %v224_v20 = vmul.f32 %v747_v52, %v212_v17  ;;  %v213_v24 = vmul.f32 %v205_v18, %v663_v41  ;;  %v139_v26 = vmul.f32 0.5, %v138_v21 }
 0x113   :  { %v180_v25 = vsub.f32 1.5, %v179_v19  ;;  %v220_v42 = vmul.f32 %v747_v52, %v208_v23 }
 0x114   :  { %v544_v27 = vpop.eup %543  ;;  %v236_v43 = vadd.f32 %v759_v63, %v224_v20  ;;  %v225_v30 = vmul.f32 %v747_v52, %v213_v24  ;;  %v140_v32 = vsub.f32 1.5, %v139_v26 }
 0x115   :  { %v181_v31 = vmul.f32 %v540_v4, %v180_v25  ;;  %v157_v33 = vmul.f32 %v544_v27, %v765_v5  ;;  %v232_v41 = vadd.f32 %v759_v63, %v220_v42  ;;  %vm163_vm8 = vweird.f32 %v544_v27 }
 0x116   :  { %244 = vst.msk [vmem:[%s979_s5 + $0x30] sm:$0xff] %vm30_vm0, %v236_v43  ;;  %501 = vmatmul.msk.f32.vlgmr.msra.gmra.mxu3 %vm30_vm0, %v236_v43  ;;  %v237_v34 = vadd.f32 %v759_v63, %v225_v30  ;;  %v141_v36 = vmul.f32 %v542_v8, %v140_v32  ;;  %vm164_vm10 = vmor %vm162_vm9, %vm163_vm8 }
 0x117   :  { %v185_v35 = vsel %vm184_vm6, %v540_v4, %v181_v31  ;;  %v158_v37 = vmul.f32 %v544_v27, %v157_v33  ;;  %240 = vst.msk [vmem:[%s979_s5 + $0x10] sm:$0xff] %vm30_vm0, %v232_v41  ;;  %497 = vmatmul.msk.f32.vlgmr.msra.gmra.mxu1 %vm30_vm0, %v232_v41 }
 0x118   :  { %v211_v38 = vmul.f32 %v185_v35, %v675_v47  ;;  %v145_v39 = vsel %vm144_vm7, %v542_v8, %v141_v36  ;;  %245 = vst.msk [vmem:[%s979_s5 + $0x38] sm:$0xff] %vm30_vm0, %v237_v34 }
 0x119   :  { %v159_v44 = vmul.f32 0.5, %v158_v37  ;;  %v207_v45 = vmul.f32 %v145_v39, %v682_v55 }
 0x11a   :  { %v223_v40 = vmul.f32 %v747_v52, %v211_v38 }
 0x11b   :  { %v160_v46 = vsub.f32 1.5, %v159_v44  ;;  %v219_v48 = vmul.f32 %v747_v52, %v207_v45 }
 0x11c   :  { %v235_v49 = vadd.f32 %v759_v63, %v223_v40 }
 0x11d   :  { %v161_v50 = vmul.f32 %v544_v27, %v160_v46  ;;  %v231_v47 = vadd.f32 %v759_v63, %v219_v48 }
 0x11e   :  { %243 = vst.msk [vmem:[%s979_s5 + $0x28] sm:$0xff] %vm30_vm0, %v235_v49  ;;  %500 = vmatmul.msk.f32.gmra.mxu2 %vm30_vm0, %v235_v49  ;;  %502 = vmatmul.msk.f32.gmra.mxu3 %vm30_vm0, %v237_v34 }
 0x11f   :  { %v165_v55 = vsel %vm164_vm10, %v544_v27, %v161_v50  ;;  %239 = vst.msk [vmem:[%s979_s5 + $0x8] sm:$0xff] %vm30_vm0, %v231_v47  ;;  %496 = vmatmul.msk.f32.gmra.mxu0 %vm30_vm0, %v231_v47 }
 0x120   :  { %v209_v51 = vmul.f32 %v165_v55, %v688_v58 }
 0x122   :  { %v221_v53 = vmul.f32 %v747_v52, %v209_v51 }
 0x124   :  { %v233_v54 = vadd.f32 %v759_v63, %v221_v53 }
 0x126   :  { %241 = vst.msk [vmem:[%s979_s5 + $0x18] sm:$0xff] %vm30_vm0, %v233_v54  ;;  %498 = vmatmul.msk.f32.gmra.mxu1 %vm30_vm0, %v233_v54 }
 0x18c   :  { %v295_v57 = vpop.f32.mrf.mxu0 }
 0x18d   :  { %v850_v59 = vadd.f32 %v526_v56, %v295_v57 }
 0x18f   :  { %v503_v58 = vmul.f32 -1.442695, %v850_v59 }
 0x191   :  { %545 = vpow2.f32 %v503_v58  ;;  %v307_v52 = vpop.f32.mrf.mxu2 }
 0x192   :  { %v853_v61 = vadd.f32 %v526_v56, %v307_v52 }
 0x194   :  { %v301_v60 = vpop.f32.mrf.mxu1  ;;  %v507_v0 = vmul.f32 -1.442695, %v853_v61 }
 0x195   :  { %v855_v62 = vadd.f32 %v526_v56, %v301_v60 }
 0x196   :  { %547 = vpow2.f32 %v507_v0 }
 0x197   :  { %v546_v63 = vpop.eup %545  ;;  %v505_v1 = vmul.f32 -1.442695, %v855_v62 }
 0x198   :  { %v343_v2 = vadd.f32 1.0, %v546_v63 }
 0x199   :  { %v313_v3 = vpop.f32.mrf.mxu3 }
 0x19a   :  { %v859_v4 = vadd.f32 %v526_v56, %v313_v3  ;;  %549 = vrcp.f32 %v343_v2  ;;  %v362_v18 = vand.u32 2147483648, %v343_v2  ;;  %v360_v20 = vand.u32 2147483647, %v343_v2 }
 0x19b   :  { %551 = vpow2.f32 %v505_v1  ;;  %vm356_vm12 = vweird.f32 %v343_v2 }
 0x19c   :  { %v509_v29 = vmul.f32 -1.442695, %v859_v4  ;;  %v298_v5 = vpop.f32.mrf.mxu0  ;;  %v548_v6 = vpop.eup %547  ;;  %v363_v30 = vor.u32 1.1754944e-38, %v362_v18  ;;  %vm361_vm14 = vcmp.eq.f32.partialorder %v360_v20, 8.507059e+37 }
 0x19d   :  { %v862_v22 = vadd.f32 %v526_v56, %v298_v5  ;;  %v865_v8 = vadd.f32 1.0, %v548_v6 }
 0x19e   :  { %553 = vpow2.f32 %v509_v29 }
 0x19f   :  { %v504_v7 = vmul.f32 -1.442695, %v862_v22  ;;  %v420_v25 = vand.u32 2147483647, %v865_v8  ;;  %v422_v26 = vand.u32 2147483648, %v865_v8  ;;  %vm416_vm15 = vweird.f32 %v865_v8 }
 0x1a0   :  { %v550_v28 = vpop.eup %549 }
 0x1a1   :  { %v310_v9 = vpop.f32.mrf.mxu2  ;;  %v552_v10 = vpop.eup %551  ;;  %v352_v11 = vmul.f32 %v550_v28, %v343_v2  ;;  %555 = vpow2.f32 %v504_v7  ;;  %vm357_vm11 = vweird.f32 %v550_v28  ;;  %vm888_vm1 = vcmp.eq.f32.partialorder %v420_v25, 8.507059e+37 }
 0x1a2   :  { %v867_v12 = vadd.f32 %v526_v56, %v310_v9  ;;  %v316_v13 = vpop.f32.mrf.mxu3  ;;  %557 = vrcp.f32 %v865_v8  ;;  %v870_v16 = vadd.f32 1.0, %v552_v10  ;;  %vm358_vm13 = vmor %vm356_vm12, %vm357_vm11  ;;  %v423_v37 = vor.u32 1.1754944e-38, %v422_v26 }
 0x1a3   :  { %v353_v15 = vsub.f32 1.0, %v352_v11  ;;  %v875_v21 = vadd.f32 %v526_v56, %v316_v13  ;;  %v304_v24 = vpop.f32.mrf.mxu1 }
 0x1a4   :  { %v554_v14 = vpop.eup %553  ;;  %v508_v17 = vmul.f32 -1.442695, %v867_v12  ;;  %559 = vrcp.f32 %v870_v16  ;;  %v884_v33 = vadd.f32 %v526_v56, %v304_v24  ;;  %v390_v45 = vand.u32 2147483647, %v870_v16 }
 0x1a5   :  { %v873_v19 = vadd.f32 1.0, %v554_v14  ;;  %v354_v23 = vmul.f32 %v550_v28, %v353_v15  ;;  %v510_v32 = vmul.f32 -1.442695, %v875_v21  ;;  %vm386_vm2 = vweird.f32 %v870_v16 }
 0x1a6   :  { %v392_v48 = vand.u32 2147483648, %v870_v16  ;;  %v506_v49 = vmul.f32 -1.442695, %v884_v33  ;;  %vm909_vm5 = vcmp.eq.f32.partialorder %v390_v45, 8.507059e+37 }
 0x1a7   :  { %561 = vrcp.f32 %v873_v19  ;;  %v556_v42 = vpop.eup %555  ;;  %v355_v27 = vadd.f32 %v550_v28, %v354_v23  ;;  %vm446_vm4 = vweird.f32 %v873_v19  ;;  %v450_v53 = vand.u32 2147483647, %v873_v19 }
 0x1a8   :  { %563 = vpow2.f32 %v508_v17  ;;  %v558_v43 = vpop.eup %557  ;;  %v881_v31 = vadd.f32 1.0, %v556_v42  ;;  %v452_v54 = vand.u32 2147483648, %v873_v19  ;;  %v393_v63 = vor.u32 1.1754944e-38, %v392_v48 }
 0x1a9   :  { %v359_v41 = vsel %vm358_vm13, %v550_v28, %v355_v27  ;;  %v412_v34 = vmul.f32 %v558_v43, %v865_v8  ;;  %vm417_vm3 = vweird.f32 %v558_v43  ;;  %vm919_vm9 = vcmp.eq.f32.partialorder %v450_v53, 8.507059e+37 }
 0x1aa   :  { %v364_v35 = vsel %vm361_vm14, %v363_v30, %v359_v41  ;;  %565 = vrcp.f32 %v881_v31  ;;  %v560_v38 = vpop.eup %559  ;;  %vm418_vm6 = vmor %vm416_vm15, %vm417_vm3  ;;  %v453_v7 = vor.u32 1.1754944e-38, %v452_v54  ;;  %v375_v13 = vand.u32 2147483647, %v881_v31 }
 0x1ab   :  { %v471_v39 = vmul.f32 %v364_v35, %v850_v59  ;;  %v413_v44 = vsub.f32 1.0, %v412_v34  ;;  %567 = vpow2.f32 %v510_v32  ;;  %v382_v46 = vmul.f32 %v560_v38, %v870_v16 }
 0x1ac   :  { %569 = vpow2.f32 %v506_v49  ;;  %vm387_vm7 = vweird.f32 %v560_v38  ;;  %v377_v14 = vand.u32 2147483648, %v881_v31  ;;  %vm371_vm13 = vweird.f32 %v881_v31 }
 0x1ad   :  { %v562_v40 = vpop.eup %561  ;;  %479 = vst.msk [vmem:[%s980_s6] sm:$0xff] %vm30_vm0, %v471_v39  ;;  %v414_v47 = vmul.f32 %v558_v43, %v413_v44  ;;  %v383_v51 = vsub.f32 1.0, %v382_v46  ;;  %vm388_vm10 = vmor %vm386_vm2, %vm387_vm7  ;;  %vm376_vm15 = vcmp.eq.f32.partialorder %v375_v13, 8.507059e+37 }
 0x1ae   :  { %v564_v50 = vpop.eup %563  ;;  %v442_v55 = vmul.f32 %v562_v40, %v873_v19  ;;  %vm447_vm8 = vweird.f32 %v562_v40  ;;  %v378_v26 = vor.u32 1.1754944e-38, %v377_v14 }
 0x1af   :  { %v907_v56 = vadd.f32 1.0, %v564_v50  ;;  %v415_v57 = vadd.f32 %v558_v43, %v414_v47  ;;  %v384_v60 = vmul.f32 %v560_v38, %v383_v51  ;;  %vm448_vm11 = vmor %vm446_vm4, %vm447_vm8 }
 0x1b0   :  { %v443_v58 = vsub.f32 1.0, %v442_v55  ;;  %v566_v52 = vpop.eup %565 }
 0x1b1   :  { %571 = vrcp.f32 %v907_v56  ;;  %v568_v0 = vpop.eup %567  ;;  %v419_v1 = vsel %vm418_vm6, %v558_v43, %v415_v57  ;;  %v367_v3 = vmul.f32 %v566_v52, %v881_v31  ;;  %v385_v5 = vadd.f32 %v560_v38, %v384_v60 }
 0x1b2   :  { %v444_v2 = vmul.f32 %v562_v40, %v443_v58  ;;  %v424_v29 = vsel %vm888_vm1, %v423_v37, %v419_v1  ;;  %v350_v10 = vadd.f32 1.0, %v568_v0  ;;  %vm372_vm12 = vweird.f32 %v566_v52  ;;  %v570_v15 = vpop.eup %569 }
 0x1b3   :  { %v475_v28 = vmul.f32 %v424_v29, %v853_v61  ;;  %v368_v9 = vsub.f32 1.0, %v367_v3  ;;  %v389_v11 = vsel %vm388_vm10, %v560_v38, %v385_v5  ;;  %vm373_vm14 = vmor %vm371_vm13, %vm372_vm12  ;;  %v346_v42 = vadd.f32 1.0, %v570_v15 }
 0x1b4   :  { %v445_v8 = vadd.f32 %v562_v40, %v444_v2  ;;  %v394_v61 = vsel %vm909_vm5, %v393_v63, %v389_v11  ;;  %573 = vrcp.f32 %v350_v10  ;;  %v437_v43 = vand.u32 2147483648, %v907_v56 }
 0x1b5   :  { %483 = vst.msk [vmem:[%s980_s6 + $0x20] sm:$0xff] %vm30_vm0, %v475_v28  ;;  %v369_v17 = vmul.f32 %v566_v52, %v368_v9  ;;  %v473_v19 = vmul.f32 %v394_v61, %v855_v62  ;;  %575 = vrcp.f32 %v346_v42  ;;  %v435_v41 = vand.u32 2147483647, %v907_v56 }
 0x1b6   :  { %v449_v16 = vsel %vm448_vm11, %v562_v40, %v445_v8  ;;  %vm431_vm2 = vweird.f32 %v907_v56  ;;  %v438_v36 = vor.u32 1.1754944e-38, %v437_v43  ;;  %v467_v39 = vand.u32 2147483648, %v350_v10 }
 0x1b7   :  { %v572_v18 = vpop.eup %571  ;;  %v454_v23 = vsel %vm919_vm9, %v453_v7, %v449_v16  ;;  %v370_v24 = vadd.f32 %v566_v52, %v369_v17  ;;  %481 = vst.msk [vmem:[%s980_s6 + $0x10] sm:$0xff] %vm30_vm0, %v473_v19  ;;  %vm436_vm4 = vcmp.eq.f32.partialorder %v435_v41, 8.507059e+37  ;;  %v465_v40 = vand.u32 2147483647, %v350_v10 }
 0x1b8   :  { %v477_v20 = vmul.f32 %v454_v23, %v859_v4  ;;  %v427_v25 = vmul.f32 %v572_v18, %v907_v56  ;;  %vm432_vm1 = vweird.f32 %v572_v18  ;;  %vm461_vm6 = vweird.f32 %v350_v10 }
 0x1b9   :  { %v374_v62 = vsel %vm373_vm14, %v566_v52, %v370_v24  ;;  %vm433_vm3 = vmor %vm431_vm2, %vm432_vm1  ;;  %v468_v50 = vor.u32 1.1754944e-38, %v467_v39  ;;  %vm466_vm8 = vcmp.eq.f32.partialorder %v465_v40, 8.507059e+37  ;;  %v407_v51 = vand.u32 2147483648, %v346_v42 }
 0x1ba   :  { %485 = vst.msk [vmem:[%s980_s6 + $0x30] sm:$0xff] %vm30_vm0, %v477_v20  ;;  %v428_v4 = vsub.f32 1.0, %v427_v25  ;;  %v379_v27 = vsel %vm376_vm15, %v378_v26, %v374_v62  ;;  %v574_v30 = vpop.eup %573  ;;  %v405_v56 = vand.u32 2147483647, %v346_v42  ;;  %vm401_vm10 = vweird.f32 %v346_v42 }
 0x1bb   :  { %v472_v31 = vmul.f32 %v379_v27, %v862_v22  ;;  %v457_v34 = vmul.f32 %v574_v30, %v350_v10  ;;  %v576_v22 = vpop.eup %575  ;;  %vm462_vm5 = vweird.f32 %v574_v30  ;;  %v408_v59 = vor.u32 1.1754944e-38, %v407_v51 }
 0x1bc   :  { %v429_v32 = vmul.f32 %v572_v18, %v428_v4  ;;  %v397_v48 = vmul.f32 %v576_v22, %v346_v42  ;;  %vm463_vm7 = vmor %vm461_vm6, %vm462_vm5  ;;  %vm402_vm9 = vweird.f32 %v576_v22  ;;  %vm406_vm12 = vcmp.eq.f32.partialorder %v405_v56, 8.507059e+37 }
 0x1bd   :  { %480 = vst.msk [vmem:[%s980_s6 + $0x8] sm:$0xff] %vm30_vm0, %v472_v31  ;;  %v458_v37 = vsub.f32 1.0, %v457_v34  ;;  %vm403_vm11 = vmor %vm401_vm10, %vm402_vm9 }
 0x1be   :  { %v430_v35 = vadd.f32 %v572_v18, %v429_v32  ;;  %v398_v47 = vsub.f32 1.0, %v397_v48 }
 0x1bf   :  { %v459_v45 = vmul.f32 %v574_v30, %v458_v37 }
 0x1c0   :  { %v434_v38 = vsel %vm433_vm3, %v572_v18, %v430_v35  ;;  %v399_v54 = vmul.f32 %v576_v22, %v398_v47 }
 0x1c1   :  { %v439_v44 = vsel %vm436_vm4, %v438_v36, %v434_v38  ;;  %v460_v49 = vadd.f32 %v574_v30, %v459_v45 }
 0x1c2   :  { %v476_v46 = vmul.f32 %v439_v44, %v867_v12  ;;  %v400_v57 = vadd.f32 %v576_v22, %v399_v54 }
 0x1c3   :  { %v464_v55 = vsel %vm463_vm7, %v574_v30, %v460_v49 }
 0x1c4   :  { %484 = vst.msk [vmem:[%s980_s6 + $0x28] sm:$0xff] %vm30_vm0, %v476_v46  ;;  %v469_v53 = vsel %vm466_vm8, %v468_v50, %v464_v55  ;;  %v404_v58 = vsel %vm403_vm11, %v576_v22, %v400_v57 }
 0x1c5   :  { %v478_v12 = vmul.f32 %v469_v53, %v875_v21  ;;  %v409_v52 = vsel %vm406_vm12, %v408_v59, %v404_v58 }
 0x1c6   :  { %v474_v60 = vmul.f32 %v409_v52, %v884_v33 }
 0x1c7   :  { %486 = vst.msk [vmem:[%s980_s6 + $0x38] sm:$0xff] %vm30_vm0, %v478_v12 }
 0x1c8   :  { %482 = vst.msk [vmem:[%s980_s6 + $0x18] sm:$0xff] %vm30_vm0, %v474_v60 }

</bundles_post_ra>
